<compile_context>
chip_gen: v6e
topology: v6e:2x2x1
jax: 0.10.0
libtpu: 0.0.40
codegen_flags: <defaults>
</compile_context>

<pallas_src>
import math
import numpy as np
import jax
import jax.numpy as jnp
from jax.experimental import pallas as pl
from jax.experimental.pallas import tpu as pltpu


# ---------------------------------------------------------------------------
# Chip-generation heuristics (tile sizes / VMEM budgets only; correctness
# never depends on these).
# ---------------------------------------------------------------------------
def _tpu_generation():
    try:
        kind = jax.devices()[0].device_kind.lower()
    except Exception:
        return "unknown"
    if "v5 lite" in kind or "v5lite" in kind or "v5e" in kind:
        return "v5e"
    if "v6" in kind:
        return "v6e"
    if "v7" in kind:
        return "v7x"
    return "unknown"


def _gen_config():
    gen = _tpu_generation()
    if gen == "v5e":   # 4x128^2 MXU, 128 MiB VMEM
        return dict(bw=128, budget=10 << 20, vmem_limit=64 << 20)
    if gen == "v6e":   # 2x256^2 MXU, 128 MiB VMEM, HBM-bound -> big blocks
        return dict(bw=256, budget=20 << 20, vmem_limit=80 << 20)
    if gen == "v7x":   # only 64 MiB VMEM per TensorCore
        return dict(bw=256, budget=7 << 20, vmem_limit=36 << 20)
    return dict(bw=256, budget=8 << 20, vmem_limit=48 << 20)


def _pick_row_block(n_rows, bytes_per_row, budget):
    """Rows per grid step: VMEM-budgeted, sublane-aligned, >=4 grid steps
    whenever there is enough work (so both v7x TensorCores pipeline)."""
    bn = max(1, budget // max(1, bytes_per_row))
    bn = min(bn, -(-n_rows // 4))
    if bn >= n_rows:
        return n_rows
    bn = max(8, bn - bn % 8)
    if bn >= n_rows:
        return n_rows
    return bn


def _split_bf16(a):
    """a (f32) -> (hi, lo) bf16 pair with hi + lo ~= a to ~2^-17 relative."""
    hi = a.astype(jnp.bfloat16)
    lo = (a - hi.astype(jnp.float32)).astype(jnp.bfloat16)
    return hi, lo


def _dot2(hi, lo, taps):
    """Two single-pass bf16 MXU matmuls with f32 accumulation (== bf16x3
    accuracy here because the taps are exact in bf16)."""
    return (jnp.dot(hi, taps, preferred_element_type=jnp.float32)
            + jnp.dot(lo, taps, preferred_element_type=jnp.float32))


# ---------------------------------------------------------------------------
# Path A ("aligned"): W % 128 == 0 and W >= 256.
#   Vertical combine on the VPU, horizontal combine + 2:1 lane compaction via
#   a combined [col-low | col-high] tap matmul on the MXU, chunked along W.
# ---------------------------------------------------------------------------
def _aligned_taps(bw):
    bwh = bw // 2
    t = np.zeros((bw, bw), dtype=np.float32)
    j = np.arange(bwh)
    t[2 * j, j] = 0.5            # col low-pass
    t[2 * j + 1, j] = 0.5
    t[2 * j, bwh + j] = 0.5      # col high-pass (reversed dec_hi = [s, -s])
    t[2 * j + 1, bwh + j] = -0.5
    return t


def _make_aligned_kernel(W, bw):
    nchunks = W // bw
    bwh = bw // 2

    def kernel(top_ref, bot_ref, taps_ref, ll_ref, lh_ref, hl_ref, hh_ref):
        taps = taps_ref[...]
        for c in range(nchunks):                   # static, unrolled
            cw = c * bw
            top = top_ref[:, cw:cw + bw]           # image row 2i
            bot = bot_ref[:, cw:cw + bw]           # image row 2i+1
            u = top + bot                          # vertical low  (scale in taps)
            v = top - bot                          # vertical high (scale in taps)
            u_hi, u_lo = _split_bf16(u)
            v_hi, v_lo = _split_bf16(v)
            ru = _dot2(u_hi, u_lo, taps)           # [LL | HL] chunk
            rv = _dot2(v_hi, v_lo, taps)           # [LH | HH] chunk
            co = c * bwh
            ll_ref[:, co:co + bwh] = ru[:, :bwh]
            hl_ref[:, co:co + bwh] = ru[:, bwh:]
            lh_ref[:, co:co + bwh] = rv[:, :bwh]
            hh_ref[:, co:co + bwh] = rv[:, bwh:]

    return kernel


def _dwt_aligned(x, cfg):
    B, C, H, W = x.shape
    Hh, Wh = H // 2, W // 2
    NR = B * C * Hh
    bw = cfg["bw"] if W % cfg["bw"] == 0 else 128
    xf = x.reshape(NR, 2 * W)                     # row = [img row 2i | img row 2i+1]
    bn = _pick_row_block(NR, 48 * W, cfg["budget"])
    grid = (pl.cdiv(NR, bn),)
    taps = jnp.asarray(_aligned_taps(bw), dtype=jnp.bfloat16)

    outs = pl.pallas_call(
        _make_aligned_kernel(W, bw),
        grid=grid,
        in_specs=[pl.BlockSpec((bn, W), lambda i: (i, 0)),    # top rows (lane 0)
                  pl.BlockSpec((bn, W), lambda i: (i, 1)),    # bottom rows (lane 0)
                  pl.BlockSpec((bw, bw), lambda i: (0, 0))],  # taps (fetched once)
        out_specs=tuple(pl.BlockSpec((bn, Wh), lambda i: (i, 0)) for _ in range(4)),
        out_shape=tuple(jax.ShapeDtypeStruct((NR, Wh), jnp.float32) for _ in range(4)),
        compiler_params=pltpu.CompilerParams(
            dimension_semantics=("parallel",),
            vmem_limit_bytes=cfg["vmem_limit"]),
    )(xf, xf, taps)
    return [o.reshape(B, C, Hh, Wh) for o in outs]


# ---------------------------------------------------------------------------
# Path B ("packed"): small / ragged W.
#   k row-pairs per kernel row; one sparse-tap matmul produces all 4 sub-bands
#   band-major, so each band's output slab is lane-dense (k*Wh % 128 == 0
#   whenever feasible).
# ---------------------------------------------------------------------------
def _choose_pack(W, NR, max_k_lanes=512):
    k = 256 // math.gcd(W, 256)              # smallest k with (k*W/2) % 128 == 0
    k = min(k, max(1, max_k_lanes // (2 * W)))
    while k > 1 and NR % k != 0:
        k -= 1
    return k


def _packed_taps(W, k):
    """(2kW, 2kW) matrix: input row = [t0|b0|t1|b1|...], output columns are
    band-major then pair then column -> [LL(kWh) | LH | HL | HH]."""
    Wh = W // 2
    q = k * Wh
    # row/col filter sign patterns for [LL, LH, HL, HH]; magnitude folded -> 0.5
    fr = np.array([[1, 1], [1, -1], [1, 1], [1, -1]], dtype=np.float32)
    fc = np.array([[1, 1], [1, 1], [1, -1], [1, -1]], dtype=np.float32)
    T = np.zeros((2 * k * W, 4 * q), dtype=np.float32)
    c = np.arange(Wh)
    for b in range(4):
        for j in range(k):
            cols = b * q + j * Wh + c
            for ri in range(2):
                for cj in range(2):
                    rows = j * 2 * W + ri * W + 2 * c + cj
                    T[rows, cols] = 0.5 * fr[b, ri] * fc[b, cj]
    return T


def _make_packed_kernel(q):
    def kernel(x_ref, taps_ref, ll_ref, lh_ref, hl_ref, hh_ref):
        x_hi, x_lo = _split_bf16(x_ref[...])
        res = _dot2(x_hi, x_lo, taps_ref[...])    # (bn, 4q) = [LL|LH|HL|HH]
        ll_ref[...] = res[:, 0 * q:1 * q]
        lh_ref[...] = res[:, 1 * q:2 * q]
        hl_ref[...] = res[:, 2 * q:3 * q]
        hh_ref[...] = res[:, 3 * q:4 * q]
    return kernel


def _dwt_packed(x, cfg):
    B, C, H, W = x.shape
    Hh, Wh = H // 2, W // 2
    NR = B * C * Hh
    k = _choose_pack(W, NR)
    q = k * Wh
    NRg = NR // k
    xf = x.reshape(NRg, 2 * k * W)

    t_np = _packed_taps(W, k)
    taps = jnp.asarray(t_np, dtype=jnp.bfloat16)
    budget = max(2 << 20, cfg["budget"] - 2 * t_np.size * 2)   # minus 2x bf16 taps
    bn = _pick_row_block(NRg, 48 * k * W, budget)
    grid = (pl.cdiv(NRg, bn),)

    outs = pl.pallas_call(
        _make_packed_kernel(q),
        grid=grid,
        in_specs=[pl.BlockSpec((bn, 2 * k * W), lambda i: (i, 0)),
                  pl.BlockSpec(t_np.shape, lambda i: (0, 0))],
        out_specs=tuple(pl.BlockSpec((bn, q), lambda i: (i, 0)) for _ in range(4)),
        out_shape=tuple(jax.ShapeDtypeStruct((NRg, q), jnp.float32) for _ in range(4)),
        compiler_params=pltpu.CompilerParams(
            dimension_semantics=("parallel",),
            vmem_limit_bytes=cfg["vmem_limit"]),
    )(xf, taps)
    return [o.reshape(B, C, Hh, Wh) for o in outs]


# ---------------------------------------------------------------------------
# Dispatcher + public wrapper (forward-pass equivalent of DWT_2D('haar')).
# Returns [x_ll, x_lh, x_hl, x_hh]; LH = high along rows / low along columns,
# matching the PyTorch module's filter construction.
# ---------------------------------------------------------------------------
def _dwt2d_forward(x):
    x = x.astype(jnp.float32)
    B, C, H, W = x.shape
    assert H % 2 == 0 and W % 2 == 0, "DWT_2D expects even spatial dims"
    cfg = _gen_config()
    if W % 128 == 0 and W >= 256:
        return _dwt_aligned(x, cfg)
    if W <= 512:
        return _dwt_packed(x, cfg)
    # Large ragged W: pad columns to a multiple of 256, run the aligned path,
    # crop. Column pairs never straddle the pad boundary (W is even), so the
    # cropped sub-bands are exact (costs one extra HBM pass for pad + crop).
    Wp = -(-W // 256) * 256
    xp = jnp.pad(x, ((0, 0), (0, 0), (0, 0), (0, Wp - W)))
    outs = _dwt_aligned(xp, cfg)
    return [o[..., : W // 2] for o in outs]


def make_dwt_2d(wave="haar"):
    if wave != "haar":
        # TODO(synk): non-Haar pywt wavelets (filters longer than 2 taps) are
        # not supported without pywt.
        raise NotImplementedError("only wave='haar' is supported")
    return jax.jit(_dwt2d_forward)


# ---------------------------------------------------------------------------
# Self-test against a float64 numpy reference (depthwise 2x2 stride-2 conv).
# ---------------------------------------------------------------------------
if __name__ == "__main__":
    def reference(xn):
        s = 1.0 / math.sqrt(2.0)
        lo = np.array([s, s], dtype=np.float64)    # reversed pywt dec_lo
        hi = np.array([s, -s], dtype=np.float64)   # reversed pywt dec_hi
        x00 = xn[:, :, 0::2, 0::2]
        x01 = xn[:, :, 0::2, 1::2]
        x10 = xn[:, :, 1::2, 0::2]
        x11 = xn[:, :, 1::2, 1::2]

        def band(fr, fc):   # fr: row (vertical) filter, fc: column filter
            return (fr[0] * fc[0] * x00 + fr[0] * fc[1] * x01
                    + fr[1] * fc[0] * x10 + fr[1] * fc[1] * x11)

        # [LL, LH, HL, HH]; LH = row-high / col-low (matches DWT_2D).
        return [band(lo, lo), band(hi, lo), band(lo, hi), band(hi, hi)]

    dwt = make_dwt_2d("haar")
    key = jax.random.PRNGKey(0)
    # First shape matches the module's typical small input (packed path);
    # second small shape exercises the aligned (W % 128 == 0) path.
    for shp in [(2, 4, 16, 16), (1, 2, 8, 256)]:
        key, sub = jax.random.split(key)
        x = jax.random.normal(sub, shp, dtype=jnp.float32)
        outs = [jax.block_until_ready(o) for o in dwt(x)]
        refs = reference(np.asarray(x, dtype=np.float64))
        for o, r in zip(outs, refs):
            assert o.shape == (shp[0], shp[1], shp[2] // 2, shp[3] // 2)
            # hi/lo bf16 split with exact bf16 taps keeps error ~1e-5 abs;
            # this tolerance would catch a single-pass bf16 regression (~4e-3).
            np.testing.assert_allclose(np.asarray(o, dtype=np.float64), r,
                                       rtol=1e-4, atol=1e-4)

    print("KERNEL_OK")
</pallas_src>

<mosaic_0001>
module attributes {stable_mosaic.version = 11 : i64} {
  func.func @kernel(%arg0: i32, %arg1: memref<4x512xf32, #tpu.memory_space<vmem>>, %arg2: memref<512x512xbf16, #tpu.memory_space<vmem>>, %arg3: memref<4x128xf32, #tpu.memory_space<vmem>>, %arg4: memref<4x128xf32, #tpu.memory_space<vmem>>, %arg5: memref<4x128xf32, #tpu.memory_space<vmem>>, %arg6: memref<4x128xf32, #tpu.memory_space<vmem>>) attributes {dimension_semantics = [#tpu.dimension_semantics<parallel>], iteration_bounds = array<i64: 1>, scalar_prefetch = 0 : i64, scratch_operands = 0 : i64, tpu.core_type = #tpu.core_type<tc>, window_params = [{transform_indices = @transform_0, window_bounds = array<i64: 4, 512>}, {pipeline_mode = #tpu.pipeline_mode<synchronous>, transform_indices = @transform_1, window_bounds = array<i64: 512, 512>}, {transform_indices = @transform_2, window_bounds = array<i64: 4, 128>}, {transform_indices = @transform_3, window_bounds = array<i64: 4, 128>}, {transform_indices = @transform_4, window_bounds = array<i64: 4, 128>}, {transform_indices = @transform_5, window_bounds = array<i64: 4, 128>}]} {
    %c0 = arith.constant 0 : index
    %c0_0 = arith.constant 0 : index
    %0 = vector.load %arg1[%c0, %c0_0] : memref<4x512xf32, #tpu.memory_space<vmem>>, vector<4x512xf32>
    %1 = arith.truncf %0 : vector<4x512xf32> to vector<4x512xbf16>
    %2 = arith.extf %1 : vector<4x512xbf16> to vector<4x512xf32>
    %3 = arith.subf %0, %2 : vector<4x512xf32>
    %4 = arith.truncf %3 : vector<4x512xf32> to vector<4x512xbf16>
    %c0_1 = arith.constant 0 : index
    %c0_2 = arith.constant 0 : index
    %5 = vector.load %arg2[%c0_1, %c0_2] : memref<512x512xbf16, #tpu.memory_space<vmem>>, vector<512x512xbf16>
    %cst = arith.constant dense<0.000000e+00> : vector<4x512xf32>
    %6 = tpu.matmul %1, %5, %cst {dimension_numbers = #tpu.dot_dimension_numbers<[1], [0], [0], [1], [0, 0, 1, 1], [], []>} : vector<4x512xbf16>, vector<512x512xbf16>, vector<4x512xf32> -> vector<4x512xf32>
    %cst_3 = arith.constant dense<0.000000e+00> : vector<4x512xf32>
    %7 = tpu.matmul %4, %5, %cst_3 {dimension_numbers = #tpu.dot_dimension_numbers<[1], [0], [0], [1], [0, 0, 1, 1], [], []>} : vector<4x512xbf16>, vector<512x512xbf16>, vector<4x512xf32> -> vector<4x512xf32>
    %8 = arith.addf %6, %7 : vector<4x512xf32>
    %9 = vector.extract_strided_slice %8 {offsets = [0, 0], sizes = [4, 128], strides = [1, 1]} : vector<4x512xf32> to vector<4x128xf32>
    %c0_4 = arith.constant 0 : index
    %c0_5 = arith.constant 0 : index
    %10 = vector.load %arg3[%c0_4, %c0_5] : memref<4x128xf32, #tpu.memory_space<vmem>>, vector<4x128xf32>
    tpu.vector_store %arg3[%c0_4, %c0_5], %9 {strides = array<i32>} : memref<4x128xf32, #tpu.memory_space<vmem>>, vector<4x128xf32>,
    %11 = vector.extract_strided_slice %8 {offsets = [0, 128], sizes = [4, 128], strides = [1, 1]} : vector<4x512xf32> to vector<4x128xf32>
    %c0_6 = arith.constant 0 : index
    %c0_7 = arith.constant 0 : index
    %12 = vector.load %arg4[%c0_6, %c0_7] : memref<4x128xf32, #tpu.memory_space<vmem>>, vector<4x128xf32>
    tpu.vector_store %arg4[%c0_6, %c0_7], %11 {strides = array<i32>} : memref<4x128xf32, #tpu.memory_space<vmem>>, vector<4x128xf32>,
    %13 = vector.extract_strided_slice %8 {offsets = [0, 256], sizes = [4, 128], strides = [1, 1]} : vector<4x512xf32> to vector<4x128xf32>
    %c0_8 = arith.constant 0 : index
    %c0_9 = arith.constant 0 : index
    %14 = vector.load %arg5[%c0_8, %c0_9] : memref<4x128xf32, #tpu.memory_space<vmem>>, vector<4x128xf32>
    tpu.vector_store %arg5[%c0_8, %c0_9], %13 {strides = array<i32>} : memref<4x128xf32, #tpu.memory_space<vmem>>, vector<4x128xf32>,
    %15 = vector.extract_strided_slice %8 {offsets = [0, 384], sizes = [4, 128], strides = [1, 1]} : vector<4x512xf32> to vector<4x128xf32>
    %c0_10 = arith.constant 0 : index
    %c0_11 = arith.constant 0 : index
    %16 = vector.load %arg6[%c0_10, %c0_11] : memref<4x128xf32, #tpu.memory_space<vmem>>, vector<4x128xf32>
    tpu.vector_store %arg6[%c0_10, %c0_11], %15 {strides = array<i32>} : memref<4x128xf32, #tpu.memory_space<vmem>>, vector<4x128xf32>,
    return
  }
  func.func @transform_0(%arg0: i32) -> (i32, i32) {
    %c0_i32 = arith.constant 0 : i32
    %c0_i32_0 = arith.constant 0 : i32
    return %arg0, %c0_i32 : i32, i32
  }
  func.func @transform_1(%arg0: i32) -> (i32, i32) {
    %c0_i32 = arith.constant 0 : i32
    %c0_i32_0 = arith.constant 0 : i32
    %c0_i32_1 = arith.constant 0 : i32
    return %c0_i32, %c0_i32_0 : i32, i32
  }
  func.func @transform_2(%arg0: i32) -> (i32, i32) {
    %c0_i32 = arith.constant 0 : i32
    %c0_i32_0 = arith.constant 0 : i32
    return %arg0, %c0_i32 : i32, i32
  }
  func.func @transform_3(%arg0: i32) -> (i32, i32) {
    %c0_i32 = arith.constant 0 : i32
    %c0_i32_0 = arith.constant 0 : i32
    return %arg0, %c0_i32 : i32, i32
  }
  func.func @transform_4(%arg0: i32) -> (i32, i32) {
    %c0_i32 = arith.constant 0 : i32
    %c0_i32_0 = arith.constant 0 : i32
    return %arg0, %c0_i32 : i32, i32
  }
  func.func @transform_5(%arg0: i32) -> (i32, i32) {
    %c0_i32 = arith.constant 0 : i32
    %c0_i32_0 = arith.constant 0 : i32
    return %arg0, %c0_i32 : i32, i32
  }
}

</mosaic_0001>

<bundles_post_ra>
// kernel: _dwt2d_forward.1
= control target key start
LH: loop header
LB: loop body
LE: loop exit
PB: predicated region body
PF: predicated region fallthrough
CT: control target
= control target key end

     0   :  { %11 = vsyncpa [#allocation3], 0  ;;  %s1529_s18 = smov [#allocation2]   ;;  %s2123_s0 = inlined_call_operand.vmem [shape: f32[4,512], index: 0, kind: input, shape index: {}]   ;;  %s2124_s1 = inlined_call_operand.hbm [shape: bf16[512,512], index: 1, kind: input, shape index: {}]   ;;  %s2125_s2 = inlined_call_operand.vmem [shape: f32[4,128], index: 2, kind: output, shape index: {0}]   ;;  %s2126_s3 = inlined_call_operand.vmem [shape: f32[4,128], index: 3, kind: output, shape index: {1}]   ;;  %s2127_s4 = inlined_call_operand.vmem [shape: f32[4,128], index: 4, kind: output, shape index: {2}]   ;;  %s2128_s5 = inlined_call_operand.vmem [shape: f32[4,128], index: 5, kind: output, shape index: {3}]  }
   0x1   :  { %s19_s19 = sshll.u32 %s1529_s18, 4  ;;  %s20_s19 = int_to_ptr.vmem [resolvable:$true] %s19_s19 }
   0x2   :  { %s1515_s20 = scalar_lea.vmem %s20_s19, 16384  ;;  %p1520_p1 = scmp.lt.s32.totalorder %s20_s19, %s20_s19 }
   0x3   :  { %p1516_p0 = scmp.ne.s32.totalorder %s20_s19, %s1515_s20  ;;  %p1521_p2 = scmp.lt.s32.totalorder %s1515_s20, %s1515_s20 }
   0x5   :  { %p1522_p3 = por %p1521_p2, %p1520_p1 }
   0x7   :  { %p1523_p4 = pnand %p1522_p3, %p1516_p0 }
   0x9   :  { %1526 = shalt.err (!%p1523_p4)
}
   0xa   :  { %s1530_s21 = smov 256   ;;  %s1531_s22 = smov 16  }
   0xb   :  { %25 = dma.hbm_to_vmem [thread:$0]  %s2124_s1, 16384, %s20_s19, [#allocation3], %s1530_s21, %s1530_s21, %s1531_s22  }
   0xc   :  { %1527 = dma.done.wait [#allocation3], 16384  }
   0xd   :  { %1528 = vsyncadd [#allocation3], 4294950912  ;;  %v1565_v0 = vld [vmem:[#allocation2 + $0xe4] ss:$16 sps:$4 sm:$0xff]   ;;  %v1570_v2 = vld [vmem:[#allocation2 + $0xe0] ss:$16 sps:$4 sm:$0xff]  }
   0xe   :  { %v1567_v1 = vld [vmem:[#allocation2 + $0x2e4] ss:$16 sps:$4 sm:$0xff]   ;;  %833 = vmatprep.subr.bf16.mxu0 %v1565_v0  ;;  %v1572_v3 = vld [vmem:[#allocation2 + $0x2e0] ss:$16 sps:$4 sm:$0xff]   ;;  %v30_v49 = vld [vmem:[%s2123_s0 + $0x8] sm:$0xff] }
   0xf   :  { %874 = vmatprep.subr.bf16.mxu1 %v1567_v1  ;;  %v1575_v4 = vld [vmem:[#allocation2 + $0xc4] ss:$16 sps:$4 sm:$0xff]   ;;  %834 = vmatpush1.bf16.msra.mxu0 %v1570_v2  ;;  %v1581_v6 = vld [vmem:[#allocation2 + $0xc0] ss:$16 sps:$4 sm:$0xff]   ;;  %v34_v52 = vcombine.high %v30_v49, %v30_v49  ;;  %v1713_v53 = vpack.c.bf16 %v30_v49, %v30_v49 }
  0x10   :  { %875 = vmatpush1.bf16.msra.mxu1 %v1572_v3  ;;  %v1579_v5 = vld [vmem:[#allocation2 + $0x2c4] ss:$16 sps:$4 sm:$0xff]   ;;  %835 = vmatprep.subr.bf16.mxu0 %v1575_v4  ;;  %v1584_v7 = vld [vmem:[#allocation2 + $0x2c0] ss:$16 sps:$4 sm:$0xff]  }
  0x11   :  { %876 = vmatprep.subr.bf16.mxu1 %v1579_v5  ;;  %v1587_v8 = vld [vmem:[#allocation2 + $0xa4] ss:$16 sps:$4 sm:$0xff]   ;;  %v1591_v10 = vld [vmem:[#allocation2 + $0xa0] ss:$16 sps:$4 sm:$0xff]   ;;  %2206 = vst [vmem:[#allocation10_spill] sm:$0xff] %v1713_v53  ;;  %v1724_v58 = vpack.c.bf16 %v34_v52, %v34_v52  ;;  %v43_v59 = vunpack.c.l.bf16 %v1713_v53 }
  0x12   :  { %v1589_v9 = vld [vmem:[#allocation2 + $0x2a4] ss:$16 sps:$4 sm:$0xff]   ;;  %v1593_v11 = vld [vmem:[#allocation2 + $0x2a0] ss:$16 sps:$4 sm:$0xff]  }
  0x13   :  { %836 = vmatpush1.bf16.msra.mxu0 %v1581_v6  ;;  %v1597_v12 = vld [vmem:[#allocation2 + $0x84] ss:$16 sps:$4 sm:$0xff]   ;;  %v1603_v14 = vld [vmem:[#allocation2 + $0x80] ss:$16 sps:$4 sm:$0xff]   ;;  %v44_v63 = vunpack.c.l.bf16 %v1724_v58 }
  0x14   :  { %877 = vmatpush1.bf16.msra.mxu1 %v1584_v7  ;;  %837 = vmatprep.subr.bf16.mxu0 %v1587_v8  ;;  %v1601_v13 = vld [vmem:[#allocation2 + $0x284] ss:$16 sps:$4 sm:$0xff]   ;;  %v1607_v15 = vld [vmem:[#allocation2 + $0x280] ss:$16 sps:$4 sm:$0xff]  }
  0x15   :  { %878 = vmatprep.subr.bf16.mxu1 %v1589_v9  ;;  %v1609_v16 = vld [vmem:[#allocation2 + $0x64] ss:$16 sps:$4 sm:$0xff]   ;;  %v1615_v18 = vld [vmem:[#allocation2 + $0x60] ss:$16 sps:$4 sm:$0xff]  }
  0x16   :  { %v1613_v17 = vld [vmem:[#allocation2 + $0x264] ss:$16 sps:$4 sm:$0xff]   ;;  %v1617_v19 = vld [vmem:[#allocation2 + $0x260] ss:$16 sps:$4 sm:$0xff]  }
  0x17   :  { %838 = vmatpush1.bf16.msra.mxu0 %v1591_v10  ;;  %v1621_v20 = vld [vmem:[#allocation2 + $0x44] ss:$16 sps:$4 sm:$0xff]   ;;  %v1627_v22 = vld [vmem:[#allocation2 + $0x40] ss:$16 sps:$4 sm:$0xff]  }
  0x18   :  { %879 = vmatpush1.bf16.msra.mxu1 %v1593_v11  ;;  %839 = vmatprep.subr.bf16.mxu0 %v1597_v12  ;;  %v1625_v21 = vld [vmem:[#allocation2 + $0x244] ss:$16 sps:$4 sm:$0xff]   ;;  %v1631_v23 = vld [vmem:[#allocation2 + $0x240] ss:$16 sps:$4 sm:$0xff]  }
  0x19   :  { %880 = vmatprep.subr.bf16.mxu1 %v1601_v13  ;;  %v1633_v24 = vld [vmem:[#allocation2 + $0x24] ss:$16 sps:$4 sm:$0xff]   ;;  %v1639_v26 = vld [vmem:[#allocation2 + $0x20] ss:$16 sps:$4 sm:$0xff]  }
  0x1a   :  { %v1637_v25 = vld [vmem:[#allocation2 + $0x224] ss:$16 sps:$4 sm:$0xff]   ;;  %v1641_v27 = vld [vmem:[#allocation2 + $0x220] ss:$16 sps:$4 sm:$0xff]  }
  0x1b   :  { %840 = vmatpush1.bf16.msra.mxu0 %v1603_v14  ;;  %v1645_v28 = vld [vmem:[#allocation2 + $0x4] ss:$16 sps:$4 sm:$0xff]   ;;  %v1651_v30 = vld [vmem:[#allocation2] ss:$16 sps:$4 sm:$0xff]  }
  0x1c   :  { %881 = vmatpush1.bf16.msra.mxu1 %v1607_v15  ;;  %841 = vmatprep.subr.bf16.mxu0 %v1609_v16  ;;  %v1649_v29 = vld [vmem:[#allocation2 + $0x204] ss:$16 sps:$4 sm:$0xff]   ;;  %v1655_v31 = vld [vmem:[#allocation2 + $0x200] ss:$16 sps:$4 sm:$0xff]  }
  0x1d   :  { %882 = vmatprep.subr.bf16.mxu1 %v1613_v17  ;;  %v1657_v32 = vld [vmem:[#allocation2 + $0x1e4] ss:$16 sps:$4 sm:$0xff]   ;;  %v1663_v34 = vld [vmem:[#allocation2 + $0x1e0] ss:$16 sps:$4 sm:$0xff]  }
  0x1e   :  { %v1661_v33 = vld [vmem:[#allocation2 + $0x3e4] ss:$16 sps:$4 sm:$0xff]   ;;  %v1665_v35 = vld [vmem:[#allocation2 + $0x3e0] ss:$16 sps:$4 sm:$0xff]  }
  0x1f   :  { %842 = vmatpush1.bf16.msra.mxu0 %v1615_v18  ;;  %v1669_v36 = vld [vmem:[#allocation2 + $0x1c4] ss:$16 sps:$4 sm:$0xff]   ;;  %v1675_v38 = vld [vmem:[#allocation2 + $0x1c0] ss:$16 sps:$4 sm:$0xff]  }
  0x20   :  { %883 = vmatpush1.bf16.msra.mxu1 %v1617_v19  ;;  %843 = vmatprep.subr.bf16.mxu0 %v1621_v20  ;;  %v1673_v37 = vld [vmem:[#allocation2 + $0x3c4] ss:$16 sps:$4 sm:$0xff]   ;;  %v1679_v39 = vld [vmem:[#allocation2 + $0x3c0] ss:$16 sps:$4 sm:$0xff]  }
  0x21   :  { %884 = vmatprep.subr.bf16.mxu1 %v1625_v21  ;;  %v1681_v40 = vld [vmem:[#allocation2 + $0x1a4] ss:$16 sps:$4 sm:$0xff]   ;;  %v1687_v42 = vld [vmem:[#allocation2 + $0x1a0] ss:$16 sps:$4 sm:$0xff]  }
  0x22   :  { %v1685_v41 = vld [vmem:[#allocation2 + $0x3a4] ss:$16 sps:$4 sm:$0xff]   ;;  %v1689_v43 = vld [vmem:[#allocation2 + $0x3a0] ss:$16 sps:$4 sm:$0xff]  }
  0x23   :  { %844 = vmatpush1.bf16.msra.mxu0 %v1627_v22  ;;  %v1693_v44 = vld [vmem:[#allocation2 + $0x184] ss:$16 sps:$4 sm:$0xff]   ;;  %v1709_v50 = vld [vmem:[#allocation2 + $0x180] ss:$16 sps:$4 sm:$0xff]  }
  0x24   :  { %885 = vmatpush1.bf16.msra.mxu1 %v1631_v23  ;;  %845 = vmatprep.subr.bf16.mxu0 %v1633_v24  ;;  %2201 = vst [vmem:[#allocation5_spill] sm:$0xff] %v1693_v44  ;;  %v1697_v45 = vld [vmem:[#allocation2 + $0x384] ss:$16 sps:$4 sm:$0xff]   ;;  %2204 = vst [vmem:[#allocation8_spill] sm:$0xff] %v1709_v50  ;;  %v1711_v51 = vld [vmem:[#allocation2 + $0x380] ss:$16 sps:$4 sm:$0xff]  }
  0x25   :  { %886 = vmatprep.subr.bf16.mxu1 %v1637_v25  ;;  %2202 = vst [vmem:[#allocation6_spill] sm:$0xff] %v1697_v45  ;;  %v29_v46 = vld [vmem:[%s2123_s0] sm:$0xff]  ;;  %2205 = vst [vmem:[#allocation9_spill] sm:$0xff] %v1711_v51 }
  0x26   :  { %v33_v47 = vcombine.high %v29_v46, %v29_v46  ;;  %v1702_v48 = vpack.c.bf16 %v29_v46, %v29_v46  ;;  %v1717_v54 = vld [vmem:[#allocation2 + $0x164] ss:$16 sps:$4 sm:$0xff]   ;;  %v1730_v61 = vld [vmem:[#allocation2 + $0x160] ss:$16 sps:$4 sm:$0xff]  }
  0x27   :  { %846 = vmatpush1.bf16.msra.mxu0 %v1639_v26  ;;  %2207 = vst [vmem:[#allocation11_spill] sm:$0xff] %v1717_v54  ;;  %v1719_v55 = vld [vmem:[#allocation2 + $0x364] ss:$16 sps:$4 sm:$0xff]   ;;  %v1732_v62 = vld [vmem:[#allocation2 + $0x360] ss:$16 sps:$4 sm:$0xff]  }
  0x28   :  { %887 = vmatpush1.bf16.msra.mxu1 %v1641_v27  ;;  %847 = vmatprep.subr.bf16.mxu0 %v1645_v28  ;;  %2203 = vst [vmem:[#allocation7_spill] sm:$0xff] %v1702_v48  ;;  %2208 = vst [vmem:[#allocation12_spill] sm:$0xff] %v1719_v55  ;;  %v1721_v56 = vpack.c.bf16 %v33_v47, %v33_v47  ;;  %v41_v57 = vunpack.c.l.bf16 %v1702_v48  ;;  %v1737_v47 = vld [vmem:[#allocation2 + $0x144] ss:$16 sps:$4 sm:$0xff]   ;;  %v50_v48 = vcombine.low %v43_v59, %v44_v63 }
  0x29   :  { %888 = vmatprep.subr.bf16.mxu1 %v1649_v29  ;;  %v1739_v52 = vld [vmem:[#allocation2 + $0x344] ss:$16 sps:$4 sm:$0xff]  }
  0x2a   :  { %v42_v60 = vunpack.c.l.bf16 %v1721_v56  ;;  %v1763_v63 = vld [vmem:[#allocation2 + $0x304] ss:$16 sps:$4 sm:$0xff]  }
  0x2b   :  { %848 = vmatpush1.bf16.msra.mxu0 %v1651_v30  ;;  %2216 = vst [vmem:[#allocation20_spill] sm:$0xff] %v1763_v63 }
  0x2c   :  { %889 = vmatpush1.bf16.msra.mxu1 %v1655_v31  ;;  %849 = vmatprep.subr.bf16.mxu0 %v1657_v32  ;;  %v49_v53 = vcombine.low %v41_v57, %v42_v60  ;;  %v1757_v60 = vld [vmem:[#allocation2 + $0x320] ss:$16 sps:$4 sm:$0xff]  }
  0x2d   :  { %890 = vmatprep.subr.bf16.mxu1 %v1661_v33  ;;  %2214 = vst [vmem:[#allocation18_spill] sm:$0xff] %v1757_v60 }
  0x2f   :  { %850 = vmatpush2.bf16.msra.mxu0 %v1663_v34 }
  0x30   :  { %891 = vmatpush2.bf16.msra.mxu1 %v1665_v35  ;;  %851 = vmatprep.subr.bf16.mxu0 %v1669_v36 }
  0x31   :  { %892 = vmatprep.subr.bf16.mxu1 %v1673_v37 }
  0x33   :  { %852 = vmatpush2.bf16.msra.mxu0 %v1675_v38 }
  0x34   :  { %893 = vmatpush2.bf16.msra.mxu1 %v1679_v39  ;;  %853 = vmatprep.subr.bf16.mxu0 %v1681_v40 }
  0x35   :  { %894 = vmatprep.subr.bf16.mxu1 %v1685_v41 }
  0x37   :  { %854 = vmatpush2.bf16.msra.mxu0 %v1687_v42 }
  0x38   :  { %895 = vmatpush2.bf16.msra.mxu1 %v1689_v43  ;;  %855 = vmatprep.subr.bf16.mxu0 %v1693_v44  ;;  %v54_v44 = vsub.f32 %v30_v49, %v50_v48  ;;  %v1761_v49 = vld [vmem:[#allocation2 + $0x104] ss:$16 sps:$4 sm:$0xff]  }
  0x39   :  { %896 = vmatprep.subr.bf16.mxu1 %v1697_v45  ;;  %v53_v45 = vsub.f32 %v29_v46, %v49_v53  ;;  %v1755_v53 = vld [vmem:[#allocation2 + $0x120] ss:$16 sps:$4 sm:$0xff]   ;;  %2215 = vst [vmem:[#allocation19_spill] sm:$0xff] %v1761_v49 }
  0x3a   :  { %v58_v59 = vcombine.high %v54_v44, %v54_v44  ;;  %2213 = vst [vmem:[#allocation17_spill] sm:$0xff] %v1755_v53 }
  0x3b   :  { %856 = vmatpush2.bf16.msra.mxu0 %v1709_v50  ;;  %v1745_v50 = vld [vmem:[#allocation2 + $0x340] ss:$16 sps:$4 sm:$0xff]   ;;  %v57_v57 = vcombine.high %v53_v45, %v53_v45 }
  0x3c   :  { %897 = vmatpush2.bf16.msra.mxu1 %v1711_v51  ;;  %857 = vmatprep.subr.bf16.mxu0 %v1717_v54  ;;  %v1743_v51 = vld [vmem:[#allocation2 + $0x140] ss:$16 sps:$4 sm:$0xff]   ;;  %2210 = vst [vmem:[#allocation14_spill] sm:$0xff] %v1745_v50  ;;  %v1751_v54 = vld [vmem:[#allocation2 + $0x324] ss:$16 sps:$4 sm:$0xff]   ;;  %v64_v48 = vpack.c.bf16 %v58_v59, %v58_v59 }
  0x3d   :  { %898 = vmatprep.subr.bf16.mxu1 %v1719_v55  ;;  %2209 = vst [vmem:[#allocation13_spill] sm:$0xff] %v1743_v51  ;;  %v1749_v55 = vld [vmem:[#allocation2 + $0x124] ss:$16 sps:$4 sm:$0xff]   ;;  %2212 = vst [vmem:[#allocation16_spill] sm:$0xff] %v1751_v54  ;;  %v62_v46 = vpack.c.bf16 %v57_v57, %v57_v57  ;;  %v1767_v57 = vld [vmem:[#allocation2 + $0x100] ss:$16 sps:$4 sm:$0xff]  }
  0x3e   :  { %2211 = vst [vmem:[#allocation15_spill] sm:$0xff] %v1749_v55  ;;  %906 = vmatprep.mubr.bf16.mxu1 %v64_v48  ;;  %v1773_v59 = vld [vmem:[#allocation2 + $0xec] ss:$16 sps:$4 sm:$0xff]  }
  0x3f   :  { %858 = vmatpush2.bf16.msra.mxu0 %v1730_v61  ;;  %865 = vmatprep.mubr.bf16.mxu0 %v62_v46  ;;  %2217 = vst [vmem:[#allocation21_spill] sm:$0xff] %v1773_v59 }
  0x40   :  { %899 = vmatpush2.bf16.msra.mxu1 %v1732_v62  ;;  %859 = vmatprep.subr.bf16.mxu0 %v1737_v47 }
  0x41   :  { %900 = vmatprep.subr.bf16.mxu1 %v1739_v52 }
  0x43   :  { %860 = vmatpush2.bf16.msra.mxu0 %v1743_v51  ;;  %v1779_v51 = vpack.c.bf16 %v54_v44, %v54_v44  ;;  %v1797_v44 = vld [vmem:[#allocation2 + $0xc8] ss:$16 sps:$4 sm:$0xff]  }
  0x44   :  { %901 = vmatpush2.bf16.msra.mxu1 %v1745_v50  ;;  %861 = vmatprep.subr.bf16.mxu0 %v1749_v55  ;;  %v1769_v50 = vld [vmem:[#allocation2 + $0x300] ss:$16 sps:$4 sm:$0xff]   ;;  %v1777_v55 = vpack.c.bf16 %v53_v45, %v53_v45  ;;  %v1799_v45 = vld [vmem:[#allocation2 + $0x2c8] ss:$16 sps:$4 sm:$0xff]  }
  0x45   :  { %902 = vmatprep.subr.bf16.mxu1 %v1751_v54  ;;  %v1775_v54 = vld [vmem:[#allocation2 + $0x2ec] ss:$16 sps:$4 sm:$0xff]   ;;  %2223 = vst [vmem:[#allocation27_spill] sm:$0xff] %v1799_v45 }
  0x46   :  { %2218 = vst [vmem:[#allocation22_spill] sm:$0xff] %v1775_v54 }
  0x47   :  { %862 = vmatpush2.bf16.msra.mxu0 %v1755_v53  ;;  %v1785_v53 = vld [vmem:[#allocation2 + $0x2e8] ss:$16 sps:$4 sm:$0xff]  }
  0x48   :  { %903 = vmatpush2.bf16.msra.mxu1 %v1757_v60  ;;  %863 = vmatprep.subr.bf16.mxu0 %v1761_v49  ;;  %v1783_v60 = vld [vmem:[#allocation2 + $0xe8] ss:$16 sps:$4 sm:$0xff]   ;;  %2220 = vst [vmem:[#allocation24_spill] sm:$0xff] %v1785_v53  ;;  %v1791_v49 = vld [vmem:[#allocation2 + $0x2cc] ss:$16 sps:$4 sm:$0xff]  }
  0x49   :  { %904 = vmatprep.subr.bf16.mxu1 %v1763_v63  ;;  %2219 = vst [vmem:[#allocation23_spill] sm:$0xff] %v1783_v60  ;;  %v1789_v63 = vld [vmem:[#allocation2 + $0xcc] ss:$16 sps:$4 sm:$0xff]   ;;  %2222 = vst [vmem:[#allocation26_spill] sm:$0xff] %v1791_v49 }
  0x4a   :  { %2221 = vst [vmem:[#allocation25_spill] sm:$0xff] %v1789_v63 }
  0x4b   :  { %864 = vmatpush2.bf16.msra.mxu0 %v1767_v57 }
  0x4c   :  { %905 = vmatpush2.bf16.msra.mxu1 %v1769_v50  ;;  %915 = vmatprep.subr.bf16.mxu0 %v1773_v59  ;;  %v1805_v59 = vld [vmem:[#allocation2 + $0x2ac] ss:$16 sps:$4 sm:$0xff]  }
  0x4d   :  { %956 = vmatprep.subr.bf16.mxu1 %v1775_v54  ;;  %v1803_v54 = vld [vmem:[#allocation2 + $0xac] ss:$16 sps:$4 sm:$0xff]   ;;  %2225 = vst [vmem:[#allocation29_spill] sm:$0xff] %v1805_v59 }
  0x4e   :  { %866 = vmatmul.mubr.bf16.vlgmr.msra.gmra.mxu0 %v1777_v55  ;;  %2224 = vst [vmem:[#allocation28_spill] sm:$0xff] %v1803_v54 }
  0x4f   :  { %907 = vmatmul.mubr.bf16.vlgmr.msra.gmra.mxu1 %v1779_v51  ;;  %916 = vmatpush1.bf16.msra.mxu0 %v1783_v60  ;;  %v1809_v60 = vld [vmem:[#allocation2 + $0xa8] ss:$16 sps:$4 sm:$0xff]  }
  0x50   :  { %957 = vmatpush1.bf16.msra.mxu1 %v1785_v53  ;;  %917 = vmatprep.subr.bf16.mxu0 %v1789_v63  ;;  %2226 = vst [vmem:[#allocation30_spill] sm:$0xff] %v1809_v60  ;;  %v1811_v53 = vld [vmem:[#allocation2 + $0x2a8] ss:$16 sps:$4 sm:$0xff]   ;;  %v1815_v63 = vld [vmem:[#allocation2 + $0x8c] ss:$16 sps:$4 sm:$0xff]  }
  0x51   :  { %958 = vmatprep.subr.bf16.mxu1 %v1791_v49  ;;  %947 = vmatprep.mubr.bf16.mxu0 %v62_v46  ;;  %2227 = vst [vmem:[#allocation31_spill] sm:$0xff] %v1811_v53  ;;  %2228 = vst [vmem:[#allocation32_spill] sm:$0xff] %v1815_v63  ;;  %v1817_v49 = vld [vmem:[#allocation2 + $0x28c] ss:$16 sps:$4 sm:$0xff]   ;;  %v1821_v46 = vld [vmem:[#allocation2 + $0x88] ss:$16 sps:$4 sm:$0xff]  }
  0x52   :  { %988 = vmatprep.mubr.bf16.mxu1 %v64_v48  ;;  %2229 = vst [vmem:[#allocation33_spill] sm:$0xff] %v1817_v49  ;;  %2230 = vst [vmem:[#allocation34_spill] sm:$0xff] %v1821_v46  ;;  %v1823_v48 = vld [vmem:[#allocation2 + $0x288] ss:$16 sps:$4 sm:$0xff]  }
  0x53   :  { %918 = vmatpush1.bf16.msra.mxu0 %v1797_v44  ;;  %2231 = vst [vmem:[#allocation35_spill] sm:$0xff] %v1823_v48 }
  0x54   :  { %959 = vmatpush1.bf16.msra.mxu1 %v1799_v45  ;;  %919 = vmatprep.subr.bf16.mxu0 %v1803_v54  ;;  %v1827_v45 = vld [vmem:[#allocation2 + $0x6c] ss:$16 sps:$4 sm:$0xff]  }
  0x55   :  { %960 = vmatprep.subr.bf16.mxu1 %v1805_v59  ;;  %2232 = vst [vmem:[#allocation36_spill] sm:$0xff] %v1827_v45  ;;  %v1829_v54 = vld [vmem:[#allocation2 + $0x26c] ss:$16 sps:$4 sm:$0xff]   ;;  %v1833_v59 = vld [vmem:[#allocation2 + $0x68] ss:$16 sps:$4 sm:$0xff]  }
  0x56   :  { %2233 = vst [vmem:[#allocation37_spill] sm:$0xff] %v1829_v54  ;;  %2234 = vst [vmem:[#allocation38_spill] sm:$0xff] %v1833_v59 }
  0x57   :  { %920 = vmatpush1.bf16.msra.mxu0 %v1809_v60  ;;  %v1835_v60 = vld [vmem:[#allocation2 + $0x268] ss:$16 sps:$4 sm:$0xff]  }
  0x58   :  { %961 = vmatpush1.bf16.msra.mxu1 %v1811_v53  ;;  %921 = vmatprep.subr.bf16.mxu0 %v1815_v63  ;;  %2235 = vst [vmem:[#allocation39_spill] sm:$0xff] %v1835_v60  ;;  %v1839_v53 = vld [vmem:[#allocation2 + $0x4c] ss:$16 sps:$4 sm:$0xff]  }
  0x59   :  { %962 = vmatprep.subr.bf16.mxu1 %v1817_v49  ;;  %2236 = vst [vmem:[#allocation40_spill] sm:$0xff] %v1839_v53  ;;  %v1841_v63 = vld [vmem:[#allocation2 + $0x24c] ss:$16 sps:$4 sm:$0xff]   ;;  %v1845_v49 = vld [vmem:[#allocation2 + $0x48] ss:$16 sps:$4 sm:$0xff]  }
  0x5a   :  { %2237 = vst [vmem:[#allocation41_spill] sm:$0xff] %v1841_v63  ;;  %2238 = vst [vmem:[#allocation42_spill] sm:$0xff] %v1845_v49 }
  0x5b   :  { %922 = vmatpush1.bf16.msra.mxu0 %v1821_v46  ;;  %v1847_v46 = vld [vmem:[#allocation2 + $0x248] ss:$16 sps:$4 sm:$0xff]  }
  0x5c   :  { %963 = vmatpush1.bf16.msra.mxu1 %v1823_v48  ;;  %923 = vmatprep.subr.bf16.mxu0 %v1827_v45  ;;  %2239 = vst [vmem:[#allocation43_spill] sm:$0xff] %v1847_v46  ;;  %v1851_v48 = vld [vmem:[#allocation2 + $0x2c] ss:$16 sps:$4 sm:$0xff]  }
  0x5d   :  { %964 = vmatprep.subr.bf16.mxu1 %v1829_v54  ;;  %2240 = vst [vmem:[#allocation44_spill] sm:$0xff] %v1851_v48  ;;  %v1853_v45 = vld [vmem:[#allocation2 + $0x22c] ss:$16 sps:$4 sm:$0xff]   ;;  %v1857_v54 = vld [vmem:[#allocation2 + $0x28] ss:$16 sps:$4 sm:$0xff]  }
  0x5e   :  { %2241 = vst [vmem:[#allocation45_spill] sm:$0xff] %v1853_v45  ;;  %2242 = vst [vmem:[#allocation46_spill] sm:$0xff] %v1857_v54 }
  0x5f   :  { %924 = vmatpush1.bf16.msra.mxu0 %v1833_v59  ;;  %v1859_v59 = vld [vmem:[#allocation2 + $0x228] ss:$16 sps:$4 sm:$0xff]  }
  0x60   :  { %965 = vmatpush1.bf16.msra.mxu1 %v1835_v60  ;;  %925 = vmatprep.subr.bf16.mxu0 %v1839_v53  ;;  %2243 = vst [vmem:[#allocation47_spill] sm:$0xff] %v1859_v59  ;;  %v1863_v60 = vld [vmem:[#allocation2 + $0xc] ss:$16 sps:$4 sm:$0xff]  }
  0x61   :  { %966 = vmatprep.subr.bf16.mxu1 %v1841_v63  ;;  %2244 = vst [vmem:[#allocation48_spill] sm:$0xff] %v1863_v60  ;;  %v1865_v53 = vld [vmem:[#allocation2 + $0x20c] ss:$16 sps:$4 sm:$0xff]   ;;  %v1869_v63 = vld [vmem:[#allocation2 + $0x8] ss:$16 sps:$4 sm:$0xff]  }
  0x62   :  { %2245 = vst [vmem:[#allocation49_spill] sm:$0xff] %v1865_v53  ;;  %2246 = vst [vmem:[#allocation50_spill] sm:$0xff] %v1869_v63 }
  0x63   :  { %926 = vmatpush1.bf16.msra.mxu0 %v1845_v49  ;;  %v1871_v49 = vld [vmem:[#allocation2 + $0x208] ss:$16 sps:$4 sm:$0xff]  }
  0x64   :  { %967 = vmatpush1.bf16.msra.mxu1 %v1847_v46  ;;  %927 = vmatprep.subr.bf16.mxu0 %v1851_v48  ;;  %2247 = vst [vmem:[#allocation51_spill] sm:$0xff] %v1871_v49  ;;  %v1875_v46 = vld [vmem:[#allocation2 + $0x1ec] ss:$16 sps:$4 sm:$0xff]  }
  0x65   :  { %968 = vmatprep.subr.bf16.mxu1 %v1853_v45  ;;  %2248 = vst [vmem:[#allocation52_spill] sm:$0xff] %v1875_v46  ;;  %v1877_v48 = vld [vmem:[#allocation2 + $0x3ec] ss:$16 sps:$4 sm:$0xff]   ;;  %v1881_v45 = vld [vmem:[#allocation2 + $0x1e8] ss:$16 sps:$4 sm:$0xff]  }
  0x66   :  { %2249 = vst [vmem:[#allocation53_spill] sm:$0xff] %v1877_v48  ;;  %2250 = vst [vmem:[#allocation54_spill] sm:$0xff] %v1881_v45 }
  0x67   :  { %928 = vmatpush1.bf16.msra.mxu0 %v1857_v54  ;;  %v1883_v54 = vld [vmem:[#allocation2 + $0x3e8] ss:$16 sps:$4 sm:$0xff]  }
  0x68   :  { %969 = vmatpush1.bf16.msra.mxu1 %v1859_v59  ;;  %929 = vmatprep.subr.bf16.mxu0 %v1863_v60  ;;  %2251 = vst [vmem:[#allocation55_spill] sm:$0xff] %v1883_v54  ;;  %v1887_v59 = vld [vmem:[#allocation2 + $0x1cc] ss:$16 sps:$4 sm:$0xff]  }
  0x69   :  { %970 = vmatprep.subr.bf16.mxu1 %v1865_v53  ;;  %2252 = vst [vmem:[#allocation56_spill] sm:$0xff] %v1887_v59  ;;  %v1889_v60 = vld [vmem:[#allocation2 + $0x3cc] ss:$16 sps:$4 sm:$0xff]   ;;  %v1893_v53 = vld [vmem:[#allocation2 + $0x1c8] ss:$16 sps:$4 sm:$0xff]  }
  0x6a   :  { %2253 = vst [vmem:[#allocation57_spill] sm:$0xff] %v1889_v60  ;;  %2254 = vst [vmem:[#allocation58_spill] sm:$0xff] %v1893_v53 }
  0x6b   :  { %930 = vmatpush1.bf16.msra.mxu0 %v1869_v63  ;;  %v1895_v63 = vld [vmem:[#allocation2 + $0x3c8] ss:$16 sps:$4 sm:$0xff]  }
  0x6c   :  { %971 = vmatpush1.bf16.msra.mxu1 %v1871_v49  ;;  %931 = vmatprep.subr.bf16.mxu0 %v1875_v46  ;;  %2255 = vst [vmem:[#allocation59_spill] sm:$0xff] %v1895_v63  ;;  %v1899_v49 = vld [vmem:[#allocation2 + $0x1ac] ss:$16 sps:$4 sm:$0xff]  }
  0x6d   :  { %972 = vmatprep.subr.bf16.mxu1 %v1877_v48  ;;  %2256 = vst [vmem:[#allocation60_spill] sm:$0xff] %v1899_v49  ;;  %v1901_v46 = vld [vmem:[#allocation2 + $0x3ac] ss:$16 sps:$4 sm:$0xff]   ;;  %v1905_v48 = vld [vmem:[#allocation2 + $0x1a8] ss:$16 sps:$4 sm:$0xff]  }
  0x6e   :  { %2257 = vst [vmem:[#allocation61_spill] sm:$0xff] %v1901_v46  ;;  %2258 = vst [vmem:[#allocation62_spill] sm:$0xff] %v1905_v48 }
  0x6f   :  { %932 = vmatpush2.bf16.msra.mxu0 %v1881_v45  ;;  %v1907_v45 = vld [vmem:[#allocation2 + $0x3a8] ss:$16 sps:$4 sm:$0xff]  }
  0x70   :  { %973 = vmatpush2.bf16.msra.mxu1 %v1883_v54  ;;  %933 = vmatprep.subr.bf16.mxu0 %v1887_v59  ;;  %2259 = vst [vmem:[#allocation63_spill] sm:$0xff] %v1907_v45  ;;  %v1911_v54 = vld [vmem:[#allocation2 + $0x18c] ss:$16 sps:$4 sm:$0xff]  }
  0x71   :  { %974 = vmatprep.subr.bf16.mxu1 %v1889_v60  ;;  %2260 = vst [vmem:[#allocation64_spill] sm:$0xff] %v1911_v54  ;;  %v1913_v59 = vld [vmem:[#allocation2 + $0x38c] ss:$16 sps:$4 sm:$0xff]   ;;  %v1917_v60 = vld [vmem:[#allocation2 + $0x188] ss:$16 sps:$4 sm:$0xff]  }
  0x72   :  { %2261 = vst [vmem:[#allocation65_spill] sm:$0xff] %v1913_v59  ;;  %2262 = vst [vmem:[#allocation66_spill] sm:$0xff] %v1917_v60 }
  0x73   :  { %934 = vmatpush2.bf16.msra.mxu0 %v1893_v53  ;;  %v1919_v53 = vld [vmem:[#allocation2 + $0x388] ss:$16 sps:$4 sm:$0xff]  }
  0x74   :  { %975 = vmatpush2.bf16.msra.mxu1 %v1895_v63  ;;  %935 = vmatprep.subr.bf16.mxu0 %v1899_v49  ;;  %2263 = vst [vmem:[#allocation67_spill] sm:$0xff] %v1919_v53  ;;  %v1923_v63 = vld [vmem:[#allocation2 + $0x16c] ss:$16 sps:$4 sm:$0xff]  }
  0x75   :  { %976 = vmatprep.subr.bf16.mxu1 %v1901_v46  ;;  %2264 = vst [vmem:[#allocation68_spill] sm:$0xff] %v1923_v63  ;;  %v1925_v49 = vld [vmem:[#allocation2 + $0x36c] ss:$16 sps:$4 sm:$0xff]   ;;  %v1929_v46 = vld [vmem:[#allocation2 + $0x168] ss:$16 sps:$4 sm:$0xff]  }
  0x76   :  { %2265 = vst [vmem:[#allocation69_spill] sm:$0xff] %v1925_v49  ;;  %2266 = vst [vmem:[#allocation70_spill] sm:$0xff] %v1929_v46 }
  0x77   :  { %936 = vmatpush2.bf16.msra.mxu0 %v1905_v48  ;;  %v1931_v48 = vld [vmem:[#allocation2 + $0x368] ss:$16 sps:$4 sm:$0xff]  }
  0x78   :  { %977 = vmatpush2.bf16.msra.mxu1 %v1907_v45  ;;  %937 = vmatprep.subr.bf16.mxu0 %v1911_v54  ;;  %2267 = vst [vmem:[#allocation71_spill] sm:$0xff] %v1931_v48  ;;  %v1935_v45 = vld [vmem:[#allocation2 + $0x14c] ss:$16 sps:$4 sm:$0xff]  }
  0x79   :  { %978 = vmatprep.subr.bf16.mxu1 %v1913_v59  ;;  %2268 = vst [vmem:[#allocation72_spill] sm:$0xff] %v1935_v45  ;;  %v1937_v54 = vld [vmem:[#allocation2 + $0x34c] ss:$16 sps:$4 sm:$0xff]   ;;  %v1941_v59 = vld [vmem:[#allocation2 + $0x148] ss:$16 sps:$4 sm:$0xff]  }
  0x7a   :  { %2269 = vst [vmem:[#allocation73_spill] sm:$0xff] %v1937_v54  ;;  %2270 = vst [vmem:[#allocation74_spill] sm:$0xff] %v1941_v59 }
  0x7b   :  { %938 = vmatpush2.bf16.msra.mxu0 %v1917_v60  ;;  %v1943_v60 = vld [vmem:[#allocation2 + $0x348] ss:$16 sps:$4 sm:$0xff]  }
  0x7c   :  { %979 = vmatpush2.bf16.msra.mxu1 %v1919_v53  ;;  %939 = vmatprep.subr.bf16.mxu0 %v1923_v63  ;;  %v1947_v53 = vld [vmem:[#allocation2 + $0x12c] ss:$16 sps:$4 sm:$0xff]  }
  0x7d   :  { %980 = vmatprep.subr.bf16.mxu1 %v1925_v49  ;;  %v1949_v63 = vld [vmem:[#allocation2 + $0x32c] ss:$16 sps:$4 sm:$0xff]   ;;  %v1953_v49 = vld [vmem:[#allocation2 + $0x128] ss:$16 sps:$4 sm:$0xff]  }
  0x7f   :  { %940 = vmatpush2.bf16.msra.mxu0 %v1929_v46  ;;  %v1955_v46 = vld [vmem:[#allocation2 + $0x328] ss:$16 sps:$4 sm:$0xff]  }
  0x80   :  { %981 = vmatpush2.bf16.msra.mxu1 %v1931_v48  ;;  %941 = vmatprep.subr.bf16.mxu0 %v1935_v45  ;;  %v1959_v48 = vld [vmem:[#allocation2 + $0x10c] ss:$16 sps:$4 sm:$0xff]  }
  0x81   :  { %982 = vmatprep.subr.bf16.mxu1 %v1937_v54  ;;  %v1961_v45 = vld [vmem:[#allocation2 + $0x30c] ss:$16 sps:$4 sm:$0xff]   ;;  %v1965_v54 = vld [vmem:[#allocation2 + $0x108] ss:$16 sps:$4 sm:$0xff]  }
  0x83   :  { %942 = vmatpush2.bf16.msra.mxu0 %v1941_v59  ;;  %v1967_v59 = vld [vmem:[#allocation2 + $0x308] ss:$16 sps:$4 sm:$0xff]  }
  0x84   :  { %983 = vmatpush2.bf16.msra.mxu1 %v1943_v60  ;;  %943 = vmatprep.subr.bf16.mxu0 %v1947_v53 }
  0x85   :  { %984 = vmatprep.subr.bf16.mxu1 %v1949_v63 }
  0x87   :  { %944 = vmatpush2.bf16.msra.mxu0 %v1953_v49 }
  0x88   :  { %985 = vmatpush2.bf16.msra.mxu1 %v1955_v46  ;;  %945 = vmatprep.subr.bf16.mxu0 %v1959_v48 }
  0x89   :  { %986 = vmatprep.subr.bf16.mxu1 %v1961_v45 }
  0x8b   :  { %946 = vmatpush2.bf16.msra.mxu0 %v1965_v54 }
  0x8c   :  { %987 = vmatpush2.bf16.msra.mxu1 %v1967_v59  ;;  %997 = vmatprep.subr.bf16.mxu0 %v1565_v0  ;;  %v2271_v0 = vld [vmem:[#allocation5_spill] sm:$0xff] }
  0x8d   :  { %1038 = vmatprep.subr.bf16.mxu1 %v1567_v1  ;;  %v2272_v1 = vld [vmem:[#allocation6_spill] sm:$0xff] }
  0x8e   :  { %948 = vmatmul.mubr.bf16.vlgmr.msra.gmra.mxu0 %v1777_v55  ;;  %v2317_v55 = vld [vmem:[#allocation51_spill] sm:$0xff] }
  0x8f   :  { %989 = vmatmul.mubr.bf16.vlgmr.msra.gmra.mxu1 %v1779_v51  ;;  %998 = vmatpush1.bf16.msra.mxu0 %v1570_v2  ;;  %v2273_v2 = vld [vmem:[#allocation8_spill] sm:$0xff]  ;;  %v2316_v51 = vld [vmem:[#allocation50_spill] sm:$0xff] }
  0x90   :  { %1039 = vmatpush1.bf16.msra.mxu1 %v1572_v3  ;;  %999 = vmatprep.subr.bf16.mxu0 %v1575_v4  ;;  %v2274_v3 = vld [vmem:[#allocation9_spill] sm:$0xff]  ;;  %v2275_v4 = vld [vmem:[#allocation11_spill] sm:$0xff] }
  0x91   :  { %1040 = vmatprep.subr.bf16.mxu1 %v1579_v5  ;;  %1029 = vmatprep.mubr.bf16.mxu0 %v1721_v56  ;;  %v2276_v5 = vld [vmem:[#allocation12_spill] sm:$0xff] }
  0x92   :  { %1070 = vmatprep.mubr.bf16.mxu1 %v1724_v58 }
  0x93   :  { %1000 = vmatpush1.bf16.msra.mxu0 %v1581_v6  ;;  %v2277_v6 = vld [vmem:[#allocation13_spill] sm:$0xff] }
  0x94   :  { %1041 = vmatpush1.bf16.msra.mxu1 %v1584_v7  ;;  %1001 = vmatprep.subr.bf16.mxu0 %v1587_v8  ;;  %v2278_v7 = vld [vmem:[#allocation14_spill] sm:$0xff]  ;;  %v2279_v8 = vld [vmem:[#allocation15_spill] sm:$0xff] }
  0x95   :  { %1042 = vmatprep.subr.bf16.mxu1 %v1589_v9  ;;  %v2280_v9 = vld [vmem:[#allocation16_spill] sm:$0xff] }
  0x97   :  { %1002 = vmatpush1.bf16.msra.mxu0 %v1591_v10  ;;  %v2281_v10 = vld [vmem:[#allocation17_spill] sm:$0xff] }
  0x98   :  { %1043 = vmatpush1.bf16.msra.mxu1 %v1593_v11  ;;  %1003 = vmatprep.subr.bf16.mxu0 %v1597_v12  ;;  %v2282_v11 = vld [vmem:[#allocation18_spill] sm:$0xff]  ;;  %v2283_v12 = vld [vmem:[#allocation19_spill] sm:$0xff] }
  0x99   :  { %1044 = vmatprep.subr.bf16.mxu1 %v1601_v13  ;;  %v2284_v13 = vld [vmem:[#allocation20_spill] sm:$0xff] }
  0x9b   :  { %1004 = vmatpush1.bf16.msra.mxu0 %v1603_v14  ;;  %v2285_v14 = vld [vmem:[#allocation21_spill] sm:$0xff] }
  0x9c   :  { %1045 = vmatpush1.bf16.msra.mxu1 %v1607_v15  ;;  %1005 = vmatprep.subr.bf16.mxu0 %v1609_v16  ;;  %v2286_v15 = vld [vmem:[#allocation22_spill] sm:$0xff]  ;;  %v2287_v16 = vld [vmem:[#allocation7_spill] sm:$0xff] }
  0x9d   :  { %1046 = vmatprep.subr.bf16.mxu1 %v1613_v17  ;;  %v2288_v17 = vld [vmem:[#allocation10_spill] sm:$0xff] }
  0x9f   :  { %1006 = vmatpush1.bf16.msra.mxu0 %v1615_v18  ;;  %v2289_v18 = vld [vmem:[#allocation23_spill] sm:$0xff] }
  0xa0   :  { %1047 = vmatpush1.bf16.msra.mxu1 %v1617_v19  ;;  %1007 = vmatprep.subr.bf16.mxu0 %v1621_v20  ;;  %v2290_v19 = vld [vmem:[#allocation24_spill] sm:$0xff]  ;;  %v2291_v20 = vld [vmem:[#allocation25_spill] sm:$0xff] }
  0xa1   :  { %1048 = vmatprep.subr.bf16.mxu1 %v1625_v21  ;;  %v2292_v21 = vld [vmem:[#allocation26_spill] sm:$0xff] }
  0xa3   :  { %1008 = vmatpush1.bf16.msra.mxu0 %v1627_v22  ;;  %v2293_v22 = vld [vmem:[#allocation27_spill] sm:$0xff] }
  0xa4   :  { %1049 = vmatpush1.bf16.msra.mxu1 %v1631_v23  ;;  %1009 = vmatprep.subr.bf16.mxu0 %v1633_v24  ;;  %v2294_v23 = vld [vmem:[#allocation28_spill] sm:$0xff]  ;;  %v2295_v24 = vld [vmem:[#allocation29_spill] sm:$0xff] }
  0xa5   :  { %1050 = vmatprep.subr.bf16.mxu1 %v1637_v25  ;;  %v2296_v25 = vld [vmem:[#allocation30_spill] sm:$0xff] }
  0xa7   :  { %1010 = vmatpush1.bf16.msra.mxu0 %v1639_v26  ;;  %v2297_v26 = vld [vmem:[#allocation31_spill] sm:$0xff] }
  0xa8   :  { %1051 = vmatpush1.bf16.msra.mxu1 %v1641_v27  ;;  %1011 = vmatprep.subr.bf16.mxu0 %v1645_v28  ;;  %v2298_v27 = vld [vmem:[#allocation32_spill] sm:$0xff]  ;;  %v2299_v28 = vld [vmem:[#allocation33_spill] sm:$0xff] }
  0xa9   :  { %1052 = vmatprep.subr.bf16.mxu1 %v1649_v29  ;;  %v2300_v29 = vld [vmem:[#allocation34_spill] sm:$0xff] }
  0xab   :  { %1012 = vmatpush1.bf16.msra.mxu0 %v1651_v30  ;;  %v2301_v30 = vld [vmem:[#allocation35_spill] sm:$0xff] }
  0xac   :  { %1053 = vmatpush1.bf16.msra.mxu1 %v1655_v31  ;;  %1013 = vmatprep.subr.bf16.mxu0 %v1657_v32  ;;  %v2302_v31 = vld [vmem:[#allocation36_spill] sm:$0xff]  ;;  %v2303_v32 = vld [vmem:[#allocation37_spill] sm:$0xff] }
  0xad   :  { %1054 = vmatprep.subr.bf16.mxu1 %v1661_v33  ;;  %v2304_v33 = vld [vmem:[#allocation38_spill] sm:$0xff] }
  0xaf   :  { %1014 = vmatpush2.bf16.msra.mxu0 %v1663_v34  ;;  %v2305_v34 = vld [vmem:[#allocation39_spill] sm:$0xff] }
  0xb0   :  { %1055 = vmatpush2.bf16.msra.mxu1 %v1665_v35  ;;  %1015 = vmatprep.subr.bf16.mxu0 %v1669_v36  ;;  %v2306_v35 = vld [vmem:[#allocation40_spill] sm:$0xff]  ;;  %v2307_v36 = vld [vmem:[#allocation41_spill] sm:$0xff] }
  0xb1   :  { %1056 = vmatprep.subr.bf16.mxu1 %v1673_v37  ;;  %v2308_v37 = vld [vmem:[#allocation42_spill] sm:$0xff] }
  0xb3   :  { %1016 = vmatpush2.bf16.msra.mxu0 %v1675_v38  ;;  %v2309_v38 = vld [vmem:[#allocation43_spill] sm:$0xff] }
  0xb4   :  { %1057 = vmatpush2.bf16.msra.mxu1 %v1679_v39  ;;  %1017 = vmatprep.subr.bf16.mxu0 %v1681_v40  ;;  %v2310_v39 = vld [vmem:[#allocation44_spill] sm:$0xff]  ;;  %v2311_v40 = vld [vmem:[#allocation45_spill] sm:$0xff] }
  0xb5   :  { %1058 = vmatprep.subr.bf16.mxu1 %v1685_v41  ;;  %v2312_v41 = vld [vmem:[#allocation46_spill] sm:$0xff] }
  0xb7   :  { %1018 = vmatpush2.bf16.msra.mxu0 %v1687_v42  ;;  %v2313_v42 = vld [vmem:[#allocation47_spill] sm:$0xff] }
  0xb8   :  { %1059 = vmatpush2.bf16.msra.mxu1 %v1689_v43  ;;  %1019 = vmatprep.subr.bf16.mxu0 %v2271_v0  ;;  %v2314_v43 = vld [vmem:[#allocation48_spill] sm:$0xff] }
  0xb9   :  { %1060 = vmatprep.subr.bf16.mxu1 %v2272_v1  ;;  %v2326_v0 = vld [vmem:[#allocation60_spill] sm:$0xff]  ;;  %v2327_v1 = vld [vmem:[#allocation61_spill] sm:$0xff] }
  0xbb   :  { %1020 = vmatpush2.bf16.msra.mxu0 %v2273_v2  ;;  %v2328_v2 = vld [vmem:[#allocation62_spill] sm:$0xff] }
  0xbc   :  { %1061 = vmatpush2.bf16.msra.mxu1 %v2274_v3  ;;  %1021 = vmatprep.subr.bf16.mxu0 %v2275_v4  ;;  %v2329_v3 = vld [vmem:[#allocation63_spill] sm:$0xff]  ;;  %v2330_v4 = vld [vmem:[#allocation64_spill] sm:$0xff] }
  0xbd   :  { %1062 = vmatprep.subr.bf16.mxu1 %v2276_v5  ;;  %v2331_v5 = vld [vmem:[#allocation65_spill] sm:$0xff] }
  0xbf   :  { %1022 = vmatpush2.bf16.msra.mxu0 %v1730_v61  ;;  %v2320_v61 = vld [vmem:[#allocation54_spill] sm:$0xff] }
  0xc0   :  { %1063 = vmatpush2.bf16.msra.mxu1 %v1732_v62  ;;  %1023 = vmatprep.subr.bf16.mxu0 %v1737_v47  ;;  %v2321_v62 = vld [vmem:[#allocation55_spill] sm:$0xff]  ;;  %v2322_v47 = vld [vmem:[#allocation56_spill] sm:$0xff] }
  0xc1   :  { %1064 = vmatprep.subr.bf16.mxu1 %v1739_v52  ;;  %v2323_v52 = vld [vmem:[#allocation57_spill] sm:$0xff] }
  0xc3   :  { %1024 = vmatpush2.bf16.msra.mxu0 %v2277_v6  ;;  %v2332_v6 = vld [vmem:[#allocation66_spill] sm:$0xff] }
  0xc4   :  { %1065 = vmatpush2.bf16.msra.mxu1 %v2278_v7  ;;  %1025 = vmatprep.subr.bf16.mxu0 %v2279_v8  ;;  %v2333_v7 = vld [vmem:[#allocation67_spill] sm:$0xff]  ;;  %v2334_v8 = vld [vmem:[#allocation68_spill] sm:$0xff] }
  0xc5   :  { %1066 = vmatprep.subr.bf16.mxu1 %v2280_v9  ;;  %v2335_v9 = vld [vmem:[#allocation69_spill] sm:$0xff] }
  0xc7   :  { %1026 = vmatpush2.bf16.msra.mxu0 %v2281_v10  ;;  %v2336_v10 = vld [vmem:[#allocation70_spill] sm:$0xff] }
  0xc8   :  { %1067 = vmatpush2.bf16.msra.mxu1 %v2282_v11  ;;  %1027 = vmatprep.subr.bf16.mxu0 %v2283_v12  ;;  %v2337_v11 = vld [vmem:[#allocation71_spill] sm:$0xff]  ;;  %v2338_v12 = vld [vmem:[#allocation72_spill] sm:$0xff] }
  0xc9   :  { %1068 = vmatprep.subr.bf16.mxu1 %v2284_v13  ;;  %v2339_v13 = vld [vmem:[#allocation73_spill] sm:$0xff] }
  0xcb   :  { %1028 = vmatpush2.bf16.msra.mxu0 %v1767_v57  ;;  %v2324_v57 = vld [vmem:[#allocation58_spill] sm:$0xff] }
  0xcc   :  { %1069 = vmatpush2.bf16.msra.mxu1 %v1769_v50  ;;  %1079 = vmatprep.subr.bf16.mxu0 %v2285_v14  ;;  %v2315_v50 = vld [vmem:[#allocation49_spill] sm:$0xff]  ;;  %v2340_v14 = vld [vmem:[#allocation74_spill] sm:$0xff] }
  0xcd   :  { %1120 = vmatprep.subr.bf16.mxu1 %v2286_v15 }
  0xce   :  { %1030 = vmatmul.mubr.bf16.vlgmr.msra.gmra.mxu0 %v2287_v16 }
  0xcf   :  { %1071 = vmatmul.mubr.bf16.vlgmr.msra.gmra.mxu1 %v2288_v17  ;;  %1080 = vmatpush1.bf16.msra.mxu0 %v2289_v18 }
  0xd0   :  { %1121 = vmatpush1.bf16.msra.mxu1 %v2290_v19  ;;  %1081 = vmatprep.subr.bf16.mxu0 %v2291_v20 }
  0xd1   :  { %1122 = vmatprep.subr.bf16.mxu1 %v2292_v21  ;;  %1111 = vmatprep.mubr.bf16.mxu0 %v1721_v56  ;;  %v2318_v56 = vld [vmem:[#allocation52_spill] sm:$0xff] }
  0xd2   :  { %1152 = vmatprep.mubr.bf16.mxu1 %v1724_v58  ;;  %v2319_v58 = vld [vmem:[#allocation53_spill] sm:$0xff] }
  0xd3   :  { %1082 = vmatpush1.bf16.msra.mxu0 %v1797_v44  ;;  %v2325_v44 = vld [vmem:[#allocation59_spill] sm:$0xff] }
  0xd4   :  { %1123 = vmatpush1.bf16.msra.mxu1 %v2293_v22  ;;  %1083 = vmatprep.subr.bf16.mxu0 %v2294_v23 }
  0xd5   :  { %1124 = vmatprep.subr.bf16.mxu1 %v2295_v24 }
  0xd7   :  { %1084 = vmatpush1.bf16.msra.mxu0 %v2296_v25 }
  0xd8   :  { %1125 = vmatpush1.bf16.msra.mxu1 %v2297_v26  ;;  %1085 = vmatprep.subr.bf16.mxu0 %v2298_v27 }
  0xd9   :  { %1126 = vmatprep.subr.bf16.mxu1 %v2299_v28 }
  0xdb   :  { %1086 = vmatpush1.bf16.msra.mxu0 %v2300_v29 }
  0xdc   :  { %1127 = vmatpush1.bf16.msra.mxu1 %v2301_v30  ;;  %1087 = vmatprep.subr.bf16.mxu0 %v2302_v31 }
  0xdd   :  { %1128 = vmatprep.subr.bf16.mxu1 %v2303_v32 }
  0xdf   :  { %1088 = vmatpush1.bf16.msra.mxu0 %v2304_v33 }
  0xe0   :  { %1129 = vmatpush1.bf16.msra.mxu1 %v2305_v34  ;;  %1089 = vmatprep.subr.bf16.mxu0 %v2306_v35 }
  0xe1   :  { %1130 = vmatprep.subr.bf16.mxu1 %v2307_v36 }
  0xe3   :  { %1090 = vmatpush1.bf16.msra.mxu0 %v2308_v37 }
  0xe4   :  { %1131 = vmatpush1.bf16.msra.mxu1 %v2309_v38  ;;  %1091 = vmatprep.subr.bf16.mxu0 %v2310_v39 }
  0xe5   :  { %1132 = vmatprep.subr.bf16.mxu1 %v2311_v40 }
  0xe7   :  { %1092 = vmatpush1.bf16.msra.mxu0 %v2312_v41 }
  0xe8   :  { %1133 = vmatpush1.bf16.msra.mxu1 %v2313_v42  ;;  %1093 = vmatprep.subr.bf16.mxu0 %v2314_v43 }
  0xe9   :  { %1134 = vmatprep.subr.bf16.mxu1 %v2315_v50 }
  0xeb   :  { %1094 = vmatpush1.bf16.msra.mxu0 %v2316_v51 }
  0xec   :  { %1135 = vmatpush1.bf16.msra.mxu1 %v2317_v55  ;;  %1095 = vmatprep.subr.bf16.mxu0 %v2318_v56 }
  0xed   :  { %1136 = vmatprep.subr.bf16.mxu1 %v2319_v58 }
  0xef   :  { %1096 = vmatpush2.bf16.msra.mxu0 %v2320_v61 }
  0xf0   :  { %1137 = vmatpush2.bf16.msra.mxu1 %v2321_v62  ;;  %1097 = vmatprep.subr.bf16.mxu0 %v2322_v47 }
  0xf1   :  { %1138 = vmatprep.subr.bf16.mxu1 %v2323_v52 }
  0xf3   :  { %1098 = vmatpush2.bf16.msra.mxu0 %v2324_v57 }
  0xf4   :  { %1139 = vmatpush2.bf16.msra.mxu1 %v2325_v44  ;;  %1099 = vmatprep.subr.bf16.mxu0 %v2326_v0 }
  0xf5   :  { %1140 = vmatprep.subr.bf16.mxu1 %v2327_v1 }
  0xf7   :  { %1100 = vmatpush2.bf16.msra.mxu0 %v2328_v2 }
  0xf8   :  { %1141 = vmatpush2.bf16.msra.mxu1 %v2329_v3  ;;  %1101 = vmatprep.subr.bf16.mxu0 %v2330_v4 }
  0xf9   :  { %1142 = vmatprep.subr.bf16.mxu1 %v2331_v5 }
  0xfb   :  { %1102 = vmatpush2.bf16.msra.mxu0 %v2332_v6 }
  0xfc   :  { %1143 = vmatpush2.bf16.msra.mxu1 %v2333_v7  ;;  %1103 = vmatprep.subr.bf16.mxu0 %v2334_v8 }
  0xfd   :  { %1144 = vmatprep.subr.bf16.mxu1 %v2335_v9 }
  0xff   :  { %1104 = vmatpush2.bf16.msra.mxu0 %v2336_v10 }
 0x100   :  { %1145 = vmatpush2.bf16.msra.mxu1 %v2337_v11  ;;  %1105 = vmatprep.subr.bf16.mxu0 %v2338_v12 }
 0x101   :  { %1146 = vmatprep.subr.bf16.mxu1 %v2339_v13 }
 0x103   :  { %1106 = vmatpush2.bf16.msra.mxu0 %v2340_v14 }
 0x104   :  { %1147 = vmatpush2.bf16.msra.mxu1 %v1943_v60  ;;  %1107 = vmatprep.subr.bf16.mxu0 %v1947_v53 }
 0x105   :  { %1148 = vmatprep.subr.bf16.mxu1 %v1949_v63 }
 0x107   :  { %1108 = vmatpush2.bf16.msra.mxu0 %v1953_v49 }
 0x108   :  { %1149 = vmatpush2.bf16.msra.mxu1 %v1955_v46  ;;  %1109 = vmatprep.subr.bf16.mxu0 %v1959_v48 }
 0x109   :  { %1150 = vmatprep.subr.bf16.mxu1 %v1961_v45 }
 0x10b   :  { %1110 = vmatpush2.bf16.msra.mxu0 %v1965_v54 }
 0x10c   :  { %1151 = vmatpush2.bf16.msra.mxu1 %v1967_v59 }
 0x10e   :  { %v867_v15 = vpop.f32.mrf.mxu0  ;;  %1112 = vmatmul.mubr.bf16.vlgmr.msra.gmra.mxu0 %v2287_v16 }
 0x10f   :  { %v908_v18 = vpop.f32.mrf.mxu1  ;;  %1153 = vmatmul.mubr.bf16.vlgmr.msra.gmra.mxu1 %v2288_v17 }
 0x110   :  { %v909_v53 = vadd.f32 %v908_v18, %v867_v15  ;;  %v869_v60 = vpop.f32.mrf.mxu0 }
 0x111   :  { %v910_v63 = vpop.f32.mrf.mxu1 }
 0x112   :  { %v911_v49 = vadd.f32 %v910_v63, %v869_v60  ;;  %v871_v19 = vpop.f32.mrf.mxu0 }
 0x113   :  { %v912_v46 = vpop.f32.mrf.mxu1 }
 0x114   :  { %v872_v20 = vpop.f32.mrf.mxu0 }
 0x115   :  { %v913_v48 = vpop.f32.mrf.mxu1 }
 0x14e   :  { %v949_v21 = vpop.f32.mrf.mxu0 }
 0x14f   :  { %v990_v45 = vpop.f32.mrf.mxu1 }
 0x150   :  { %v991_v22 = vadd.f32 %v990_v45, %v949_v21  ;;  %v951_v54 = vpop.f32.mrf.mxu0 }
 0x151   :  { %v992_v23 = vpop.f32.mrf.mxu1 }
 0x152   :  { %v993_v59 = vadd.f32 %v992_v23, %v951_v54  ;;  %v953_v24 = vpop.f32.mrf.mxu0 }
 0x153   :  { %v994_v25 = vpop.f32.mrf.mxu1 }
 0x154   :  { %v954_v26 = vpop.f32.mrf.mxu0 }
 0x155   :  { %v995_v16 = vpop.f32.mrf.mxu1 }
 0x18e   :  { %v1031_v27 = vpop.f32.mrf.mxu0 }
 0x18f   :  { %v1072_v17 = vpop.f32.mrf.mxu1  ;;  %v1032_v28 = vadd.f32 %v1031_v27, %v909_v53 }
 0x190   :  { %v1033_v29 = vpop.f32.mrf.mxu0 }
 0x191   :  { %v1074_v30 = vpop.f32.mrf.mxu1  ;;  %v1073_v31 = vadd.f32 %v1072_v17, %v1032_v28  ;;  %v1034_v32 = vadd.f32 %v1033_v29, %v911_v49 }
 0x192   :  { %v1035_v33 = vpop.f32.mrf.mxu0 }
 0x193   :  { %v1076_v34 = vpop.f32.mrf.mxu1  ;;  %1161 = vst [vmem:[%s2125_s2] sm:$0xf] %v1073_v31  ;;  %v1075_v35 = vadd.f32 %v1074_v30, %v1034_v32 }
 0x194   :  { %v1036_v36 = vpop.f32.mrf.mxu0 }
 0x195   :  { %v1077_v37 = vpop.f32.mrf.mxu1  ;;  %1162 = vst [vmem:[%s2126_s3] sm:$0xf] %v1075_v35 }
 0x1ce   :  { %v1113_v38 = vpop.f32.mrf.mxu0 }
 0x1cf   :  { %v1154_v39 = vpop.f32.mrf.mxu1  ;;  %v1114_v40 = vadd.f32 %v1113_v38, %v991_v22 }
 0x1d0   :  { %v1115_v41 = vpop.f32.mrf.mxu0 }
 0x1d1   :  { %v1156_v42 = vpop.f32.mrf.mxu1  ;;  %v1155_v43 = vadd.f32 %v1154_v39, %v1114_v40  ;;  %v1116_v50 = vadd.f32 %v1115_v41, %v993_v59 }
 0x1d2   :  { %v1117_v51 = vpop.f32.mrf.mxu0 }
 0x1d3   :  { %v1158_v55 = vpop.f32.mrf.mxu1  ;;  %1163 = vst [vmem:[%s2127_s4] sm:$0xf] %v1155_v43  ;;  %v1157_v56 = vadd.f32 %v1156_v42, %v1116_v50 }
 0x1d4   :  { %v1118_v58 = vpop.f32.mrf.mxu0 }
 0x1d5   :  { %v1159_v61 = vpop.f32.mrf.mxu1  ;;  %1164 = vst [vmem:[%s2128_s5] sm:$0xf] %v1157_v56 }
 0x1d6   :  { %1181 = vsyncpa [#allocation3], 1 }

</bundles_post_ra>
